<compile_context>
chip_gen: v7x
topology: tpu7x:2x2x1
jax: 0.10.0
libtpu: 0.0.40
codegen_flags: <defaults>
</compile_context>

<pallas_src>
import functools

import jax
import jax.numpy as jnp
from jax.experimental import pallas as pl
from jax.experimental.pallas import tpu as pltpu


def _input_proj_kernel(x_ref, wih_ref, b_ref, gx_ref):
    """gx = X_flat @ W_ih^T + (b_ih + b_hh); one big MXU matmul, M = T*B."""
    gx_ref[...] = (
        jnp.dot(x_ref[...], wih_ref[...], preferred_element_type=jnp.float32)
        + b_ref[...]
    )


def _lstm_recurrence_kernel(gx_ref, whh_ref, h_out_ref, *,
                            batch, hidden_dim, seq_len):
    """Serial LSTM recurrence over a VMEM-resident (T, B, 4H) gates slab.

    gx_ref:   (T, B, 4H)  precomputed input gates (x@W_ih^T + bias)
    whh_ref:  (H, 4H)     hidden->gates weights (transposed)
    h_out_ref:(B, H)      final hidden state
    """
    H = hidden_dim
    whh = whh_ref[...]  # load once; stays resident across all timesteps

    def step(t, carry):
        h, c = carry
        gates = gx_ref[t] + jnp.dot(h, whh, preferred_element_type=jnp.float32)
        i_g = jax.nn.sigmoid(gates[:, 0 * H:1 * H])
        f_g = jax.nn.sigmoid(gates[:, 1 * H:2 * H])
        g_g = jnp.tanh(gates[:, 2 * H:3 * H])
        o_g = jax.nn.sigmoid(gates[:, 3 * H:4 * H])
        c_new = f_g * c + i_g * g_g
        h_new = o_g * jnp.tanh(c_new)
        return (h_new, c_new)

    h0 = jnp.zeros((batch, H), jnp.float32)
    c0 = jnp.zeros((batch, H), jnp.float32)
    h_final, _ = jax.lax.fori_loop(0, seq_len, step, (h0, c0), unroll=True)
    h_out_ref[...] = h_final.astype(h_out_ref.dtype)


def _input_projection(x_flat, wih_t, bias):
    """x_flat: (T*B, E). Returns (T*B, 4H) f32."""
    TB, _ = x_flat.shape
    G = wih_t.shape[1]
    return pl.pallas_call(
        _input_proj_kernel,
        out_shape=jax.ShapeDtypeStruct((TB, G), jnp.float32),
        in_specs=[pl.BlockSpec(memory_space=pltpu.MemorySpace.VMEM)] * 3,
        out_specs=pl.BlockSpec(memory_space=pltpu.MemorySpace.VMEM),
    )(x_flat, wih_t, bias)


def _lstm_recurrence(gx3, whh_t, batch, hidden_dim, seq_len):
    """gx3: (T, B, 4H). Returns final hidden state (B, H) f32."""
    kernel = functools.partial(
        _lstm_recurrence_kernel,
        batch=batch, hidden_dim=hidden_dim, seq_len=seq_len,
    )
    return pl.pallas_call(
        kernel,
        out_shape=jax.ShapeDtypeStruct((batch, hidden_dim), jnp.float32),
        in_specs=[pl.BlockSpec(memory_space=pltpu.MemorySpace.VMEM)] * 2,
        out_specs=pl.BlockSpec(memory_space=pltpu.MemorySpace.VMEM),
    )(gx3, whh_t)


def text_encoder_forward(token_ids, params):
    """token_ids: (B, T) int32. Returns (B, H) f32 == hidden.squeeze(0)."""
    B, T = token_ids.shape
    E = params["embedding"].shape[1]
    H = params["w_hh"].shape[1]

    # Embedding gather (plain-JAX glue).
    embedded = jnp.take(params["embedding"], token_ids, axis=0)     # (B, T, E)

    # Time-major flatten so timestep t is a contiguous (B, .) row block.
    x_flat = jnp.swapaxes(embedded, 0, 1).reshape(T * B, E)         # (T*B, E)

    wih_t = jnp.transpose(params["w_ih"])                           # (E, 4H)
    whh_t = jnp.transpose(params["w_hh"])                           # (H, 4H)
    bias = (params["b_ih"] + params["b_hh"]).reshape(1, 4 * H)      # (1, 4H)

    gx = _input_projection(x_flat, wih_t, bias)                     # (T*B, 4H)
    gx3 = gx.reshape(T, B, 4 * H)   # free row-major view, no data movement

    return _lstm_recurrence(gx3, whh_t, B, H, T)                    # (B, H)


def _reference_forward(token_ids, params):
    """Pure-JAX reference (lax.scan LSTM) for a correctness check."""
    emb = jnp.take(params["embedding"], token_ids, axis=0)  # (B, T, E)
    B = emb.shape[0]
    H = params["w_hh"].shape[1]
    wih_t = params["w_ih"].T
    whh_t = params["w_hh"].T
    bias = params["b_ih"] + params["b_hh"]

    def step(carry, x_t):
        h, c = carry
        gates = x_t @ wih_t + h @ whh_t + bias
        i_g = jax.nn.sigmoid(gates[:, 0 * H:1 * H])
        f_g = jax.nn.sigmoid(gates[:, 1 * H:2 * H])
        g_g = jnp.tanh(gates[:, 2 * H:3 * H])
        o_g = jax.nn.sigmoid(gates[:, 3 * H:4 * H])
        c = f_g * c + i_g * g_g
        h = o_g * jnp.tanh(c)
        return (h, c), None

    init = (jnp.zeros((B, H), jnp.float32), jnp.zeros((B, H), jnp.float32))
    (h_final, _), _ = jax.lax.scan(step, init, jnp.swapaxes(emb, 0, 1))
    return h_final


def init_params(key, vocab_size=1000, embed_dim=64, hidden_dim=128):
    k_emb, k_wih, k_whh, k_bih, k_bhh = jax.random.split(key, 5)
    bound = 1.0 / jnp.sqrt(hidden_dim)
    return {
        "embedding": jax.random.normal(k_emb, (vocab_size, embed_dim), jnp.float32),
        "w_ih": jax.random.uniform(k_wih, (4 * hidden_dim, embed_dim), jnp.float32,
                                   -bound, bound),
        "w_hh": jax.random.uniform(k_whh, (4 * hidden_dim, hidden_dim), jnp.float32,
                                   -bound, bound),
        "b_ih": jax.random.uniform(k_bih, (4 * hidden_dim,), jnp.float32,
                                   -bound, bound),
        "b_hh": jax.random.uniform(k_bhh, (4 * hidden_dim,), jnp.float32,
                                   -bound, bound),
    }


if __name__ == "__main__":
    VOCAB, EMBED, HIDDEN = 1000, 64, 128
    B, T = 2, 8

    key = jax.random.PRNGKey(0)
    k_params, k_tokens = jax.random.split(key)
    params = init_params(k_params, VOCAB, EMBED, HIDDEN)
    token_ids = jax.random.randint(k_tokens, (B, T), 0, VOCAB, dtype=jnp.int32)

    out = jax.block_until_ready(text_encoder_forward(token_ids, params))
    assert out.shape == (B, HIDDEN) and out.dtype == jnp.float32

    ref = jax.block_until_ready(_reference_forward(token_ids, params))
    assert jnp.allclose(out, ref, atol=1e-5, rtol=1e-5), "mismatch vs JAX reference"

    print("KERNEL_OK")
</pallas_src>

<mosaic_0001>
module attributes {stable_mosaic.version = 11 : i64} {
  func.func @_input_proj_kernel(%arg0: memref<16x64xf32, #tpu.memory_space<vmem>>, %arg1: memref<64x512xf32, #tpu.memory_space<vmem>>, %arg2: memref<1x512xf32, #tpu.memory_space<vmem>>, %arg3: memref<16x512xf32, #tpu.memory_space<vmem>>) attributes {dimension_semantics = [], scalar_prefetch = 0 : i64, scratch_operands = 0 : i64, tpu.core_type = #tpu.core_type<tc>} {
    %c0 = arith.constant 0 : index
    %c0_0 = arith.constant 0 : index
    %0 = vector.load %arg0[%c0, %c0_0] : memref<16x64xf32, #tpu.memory_space<vmem>>, vector<16x64xf32>
    %c0_1 = arith.constant 0 : index
    %c0_2 = arith.constant 0 : index
    %1 = vector.load %arg1[%c0_1, %c0_2] : memref<64x512xf32, #tpu.memory_space<vmem>>, vector<64x512xf32>
    %cst = arith.constant dense<0.000000e+00> : vector<16x512xf32>
    %2 = tpu.matmul %0, %1, %cst {dimension_numbers = #tpu.dot_dimension_numbers<[1], [0], [0], [1], [0, 0, 1, 1], [], []>} : vector<16x64xf32>, vector<64x512xf32>, vector<16x512xf32> -> vector<16x512xf32>
    %c0_3 = arith.constant 0 : index
    %c0_4 = arith.constant 0 : index
    %3 = vector.load %arg2[%c0_3, %c0_4] : memref<1x512xf32, #tpu.memory_space<vmem>>, vector<1x512xf32>
    %4 = vector.broadcast %3 : vector<1x512xf32> to vector<16x512xf32>
    %5 = arith.addf %2, %4 : vector<16x512xf32>
    %c0_5 = arith.constant 0 : index
    %c0_6 = arith.constant 0 : index
    %6 = vector.load %arg3[%c0_5, %c0_6] : memref<16x512xf32, #tpu.memory_space<vmem>>, vector<16x512xf32>
    tpu.vector_store %arg3[%c0_5, %c0_6], %5 {strides = array<i32>} : memref<16x512xf32, #tpu.memory_space<vmem>>, vector<16x512xf32>,
    return
  }
}

</mosaic_0001>

<bundles_post_ra>
// kernel: tpu_custom_call.1
= control target key start
LH: loop header
LB: loop body
LE: loop exit
PB: predicated region body
PF: predicated region fallthrough
CT: control target
= control target key end

     0   :  { %8 = vsyncpa [#allocation3], 0  ;;  %s479_s0 = inlined_call_operand.hbm [shape: f32[16,64], index: 0, kind: input, shape index: {}]   ;;  %s480_s1 = inlined_call_operand.hbm [shape: f32[64,512], index: 1, kind: input, shape index: {}]   ;;  %s481_s2 = inlined_call_operand.vmem [shape: f32[1,512], index: 2, kind: input, shape index: {}]   ;;  %s482_s3 = inlined_call_operand.hbm [shape: f32[16,512], index: 3, kind: output, shape index: {}]  }
   0x1   :  { %9 = vsyncpa [#allocation6], 0 }
   0x2   :  { %10 = vsyncpa [#allocation4], 0  ;;  %s402_s12 = smov [#allocation2]   ;;  %s330_s16 = scalar_lea.hbm %s479_s0, 256 }
   0x3   :  { %s16_s13 = sshll.u32 %s402_s12, 4  ;;  %p331_p0 = scmp.ne.s32.totalorder %s479_s0, %s330_s16  ;;  %s17_s13 = int_to_ptr.vmem [resolvable:$true] %s16_s13 }
   0x4   :  { %p334_p1 = scmp.lt.u32.totalorder %s330_s16, %s479_s0 }
   0x6   :  { %p336_p2 = pnand %p334_p1, %p331_p0 }
   0x8   :  { %339 = shalt.err (!%p336_p2)
}
   0x9   :  { %s340_s21 = scalar_lea.vmem %s17_s13, 256  ;;  %p345_p4 = scmp.lt.s32.totalorder %s17_s13, %s17_s13 }
   0xa   :  { %p341_p3 = scmp.ne.s32.totalorder %s17_s13, %s340_s21  ;;  %p346_p5 = scmp.lt.s32.totalorder %s340_s21, %s340_s21 }
   0xc   :  { %p347_p6 = por %p346_p5, %p345_p4 }
   0xe   :  { %p348_p7 = pnand %p347_p6, %p341_p3 }
  0x10   :  { %351 = shalt.err (!%p348_p7)
}
  0x11   :  { %s403_s22 = smov 128   ;;  %s404_s23 = smov 8  }
  0x12   :  { %22 = dma.hbm_to_vmem [thread:$0]  %s479_s0, 256, %s17_s13, [#allocation3], %s403_s22, %s403_s22, %s404_s23  }
  0x13   :  { %s405_s26 = smov [#allocation5]   ;;  %s352_s30 = scalar_lea.hbm %s480_s1, 4096 }
  0x14   :  { %s28_s27 = sshll.u32 %s405_s26, 4  ;;  %p353_p8 = scmp.ne.s32.totalorder %s480_s1, %s352_s30  ;;  %s29_s27 = int_to_ptr.vmem [resolvable:$true] %s28_s27 }
  0x15   :  { %p356_p9 = scmp.lt.u32.totalorder %s352_s30, %s480_s1 }
  0x17   :  { %p358_p10 = pnand %p356_p9, %p353_p8 }
  0x19   :  { %361 = shalt.err (!%p358_p10)
}
  0x1a   :  { %s362_s8 = scalar_lea.vmem %s29_s27, 4096  ;;  %p367_p12 = scmp.lt.s32.totalorder %s29_s27, %s29_s27 }
  0x1b   :  { %p363_p11 = scmp.ne.s32.totalorder %s29_s27, %s362_s8  ;;  %p368_p13 = scmp.lt.s32.totalorder %s362_s8, %s362_s8 }
  0x1d   :  { %p369_p0 = por %p368_p13, %p367_p12 }
  0x1f   :  { %p370_p1 = pnand %p369_p0, %p363_p11 }
  0x21   :  { %373 = shalt.err (!%p370_p1)
}
  0x22   :  { %s406_s0 = smov 512   ;;  %s407_s9 = smov 32  }
  0x23   :  { %34 = dma.hbm_to_vmem [thread:$0]  %s480_s1, 4096, %s29_s27, [#allocation6], %s406_s0, %s406_s0, %s407_s9  }
  0x24   :  { %396 = dma.done.wait [#allocation3], 256  }
  0x25   :  { %397 = vsyncadd [#allocation3], 4294967040 }
  0x26   :  { %398 = dma.done.wait [#allocation6], 4096  }
  0x27   :  { %399 = vsyncadd [#allocation6], 4294963200  ;;  %v408_v0 = vmov 0.0   ;;  %v46_v1 = vld [vmem:[#allocation5 + $0x8] sm:$0xff]  ;;  %v48_v3 = vld [vmem:[#allocation5 + $0x18] sm:$0xff]  ;;  %vm99_vm0 = vcmask 523264   ;;  %v79_v51 = vlaneseq }
  0x28   :  { %170 = vmatprep.mubr.f32.mxu0 %v408_v0  ;;  %247 = vmatprep.mubr.f32.mxu1 %v408_v0  ;;  %v50_v2 = vld [vmem:[#allocation5 + $0x28] sm:$0xff]  ;;  %v52_v5 = vld [vmem:[#allocation5 + $0x38] sm:$0xff]  ;;  %v45_v6 = vld [vmem:[#allocation5] sm:$0xff] }
  0x29   :  { %v290_v4 = vpack.c.bf16 %v50_v2, %v46_v1  ;;  %v49_v7 = vld [vmem:[#allocation5 + $0x20] sm:$0xff]  ;;  %v306_v8 = vpack.c.bf16 %v52_v5, %v48_v3  ;;  %v47_v10 = vld [vmem:[#allocation5 + $0x10] sm:$0xff]  ;;  %v54_v12 = vld [vmem:[#allocation5 + $0x48] sm:$0xff]  ;;  %v80_v52 = vshrl.u32 %v79_v51, 7 }
  0x2a   :  { %v292_v9 = vpack.c.bf16 %v49_v7, %v45_v6  ;;  %v51_v11 = vld [vmem:[#allocation5 + $0x30] sm:$0xff]  ;;  %v58_v14 = vld [vmem:[#allocation5 + $0x68] sm:$0xff]  ;;  %v56_v15 = vld [vmem:[#allocation5 + $0x58] sm:$0xff] }
  0x2b   :  { %291 = vmatprep.subr.bf16.mxu0 %v290_v4  ;;  %v308_v13 = vpack.c.bf16 %v51_v11, %v47_v10  ;;  %v60_v16 = vld [vmem:[#allocation5 + $0x78] sm:$0xff]  ;;  %307 = vmatprep.subr.bf16.mxu1 %v306_v8  ;;  %v294_v17 = vpack.c.bf16 %v58_v14, %v54_v12  ;;  %v53_v19 = vld [vmem:[#allocation5 + $0x40] sm:$0xff]  ;;  %v55_v21 = vld [vmem:[#allocation5 + $0x50] sm:$0xff]  ;;  %v81_v53 = vsub.s32 0, %v80_v52  ;;  %v89_v55 = vsub.s32 2, %v80_v52 }
  0x2c   :  { %293 = vmatpush1.bf16.msra.mxu0 %v292_v9  ;;  %v310_v18 = vpack.c.bf16 %v60_v16, %v56_v15  ;;  %v57_v20 = vld [vmem:[#allocation5 + $0x60] sm:$0xff]  ;;  %v59_v23 = vld [vmem:[#allocation5 + $0x70] sm:$0xff]  ;;  %v62_v24 = vld [vmem:[#allocation5 + $0x88] sm:$0xff]  ;;  %v85_v56 = vsub.s32 1, %v80_v52  ;;  %v93_v57 = vsub.s32 3, %v80_v52 }
  0x2d   :  { %309 = vmatpush1.bf16.msra.mxu1 %v308_v13  ;;  %v296_v22 = vpack.c.bf16 %v57_v20, %v53_v19  ;;  %v66_v25 = vld [vmem:[#allocation5 + $0xa8] sm:$0xff]  ;;  %295 = vmatprep.subr.bf16.mxu0 %v294_v17  ;;  %v312_v26 = vpack.c.bf16 %v59_v23, %v55_v21  ;;  %v64_v28 = vld [vmem:[#allocation5 + $0x98] sm:$0xff]  ;;  %v61_v30 = vld [vmem:[#allocation5 + $0x80] sm:$0xff] }
  0x2e   :  { %311 = vmatprep.subr.bf16.mxu1 %v310_v18  ;;  %v298_v27 = vpack.c.bf16 %v66_v25, %v62_v24  ;;  %v68_v29 = vld [vmem:[#allocation5 + $0xb8] sm:$0xff]  ;;  %v65_v32 = vld [vmem:[#allocation5 + $0xa0] sm:$0xff]  ;;  %v63_v33 = vld [vmem:[#allocation5 + $0x90] sm:$0xff] }
  0x2f   :  { %v314_v31 = vpack.c.bf16 %v68_v29, %v64_v28  ;;  %v67_v34 = vld [vmem:[#allocation5 + $0xb0] sm:$0xff]  ;;  %v300_v35 = vpack.c.bf16 %v65_v32, %v61_v30  ;;  %v70_v36 = vld [vmem:[#allocation5 + $0xc8] sm:$0xff]  ;;  %v72_v38 = vld [vmem:[#allocation5 + $0xd8] sm:$0xff] }
  0x30   :  { %297 = vmatpush1.bf16.msra.mxu0 %v296_v22  ;;  %v74_v37 = vld [vmem:[#allocation5 + $0xe8] sm:$0xff]  ;;  %v316_v39 = vpack.c.bf16 %v67_v34, %v63_v33  ;;  %v76_v41 = vld [vmem:[#allocation5 + $0xf8] sm:$0xff]  ;;  %v69_v42 = vld [vmem:[#allocation5 + $0xc0] sm:$0xff] }
  0x31   :  { %313 = vmatpush1.bf16.msra.mxu1 %v312_v26  ;;  %299 = vmatprep.subr.bf16.mxu0 %v298_v27  ;;  %v302_v40 = vpack.c.bf16 %v74_v37, %v70_v36  ;;  %v73_v43 = vld [vmem:[#allocation5 + $0xe0] sm:$0xff]  ;;  %v318_v44 = vpack.c.bf16 %v76_v41, %v72_v38  ;;  %v71_v45 = vld [vmem:[#allocation5 + $0xd0] sm:$0xff]  ;;  %v44_v50 = vld [vmem:[#allocation2 + $0x8] sm:$0xff] }
  0x32   :  { %315 = vmatprep.subr.bf16.mxu1 %v314_v31  ;;  %v75_v46 = vld [vmem:[#allocation5 + $0xf0] sm:$0xff]  ;;  %v304_v47 = vpack.c.bf16 %v73_v43, %v69_v42 }
  0x33   :  { %v320_v48 = vpack.c.bf16 %v75_v46, %v71_v45  ;;  %v43_v49 = vld [vmem:[#allocation2] sm:$0xff] }
  0x34   :  { %301 = vmatpush1.bf16.msra.mxu0 %v300_v35  ;;  %v77_v54 = vld [vmem:[%s481_s2] sm:$0xf]  ;;  %s409_s2 = smov [#allocation7]  }
  0x35   :  { %317 = vmatpush1.bf16.msra.mxu1 %v316_v39  ;;  %303 = vmatprep.subr.bf16.mxu0 %v302_v40  ;;  %v82_v58 = vrot.slane %v77_v54, %v81_v53  ;;  %v90_v59 = vrot.slane %v77_v54, %v89_v55  ;;  %v86_v60 = vrot.slane %v77_v54, %v85_v56  ;;  %s273_s13 = sshll.u32 %s409_s2, 4  ;;  %s274_s13 = int_to_ptr.vmem [resolvable:$true] %s273_s13 }
  0x36   :  { %319 = vmatprep.subr.bf16.mxu1 %v318_v44  ;;  %v94_v61 = vrot.slane %v77_v54, %v93_v57  ;;  %s374_s14 = scalar_lea.vmem %s274_s13, 1024  ;;  %p379_p3 = scmp.lt.s32.totalorder %s274_s13, %s274_s13 }
  0x37   :  { %p375_p2 = scmp.ne.s32.totalorder %s274_s13, %s374_s14  ;;  %p380_p4 = scmp.lt.s32.totalorder %s374_s14, %s374_s14 }
  0x38   :  { %305 = vmatpush1.bf16.msra.mxu0 %v304_v47 }
  0x39   :  { %321 = vmatpush1.bf16.msra.mxu1 %v320_v48  ;;  %p381_p5 = por %p380_p4, %p379_p3 }
  0x3b   :  { %286 = vmatmul.mubr.msk.f32.vlgmr.msra.gmra.mrb[0].mxu0 %vm99_vm0, %v43_v49  ;;  %p382_p6 = pnand %p381_p5, %p375_p2 }
  0x3c   :  { %288 = vmatmul.mubr.msk.f32.vlgmr.msra.gmra.mrb[0].mxu1 %vm99_vm0, %v43_v49  ;;  %176 = vmatprep.mubr.f32.mxu0 %v408_v0 }
  0x3d   :  { %253 = vmatprep.mubr.f32.mxu1 %v408_v0 }
  0x3f   :  { %287 = vmatmul.mubr.msk.f32.gmra.mrb[2].mxu0 %vm99_vm0, %v44_v50 }
  0x40   :  { %289 = vmatmul.mubr.msk.f32.gmra.mrb[2].mxu1 %vm99_vm0, %v44_v50 }
 0x10e   :  { %v172_v62 = vpop.f32.mrb[0].mxu0 }
 0x10f   :  { %v173_v63 = vadd.f32 %v172_v62, %v82_v58  ;;  %v249_v1 = vpop.f32.mrb[0].mxu1  ;;  %v174_v0 = vpop.f32.mrb[1].mxu0 }
 0x110   :  { %v250_v2 = vadd.f32 %v249_v1, %v90_v59  ;;  %v175_v3 = vadd.f32 %v174_v0, %v86_v60  ;;  %v251_v4 = vpop.f32.mrb[1].mxu1 }
 0x111   :  { %260 = vst [vmem:[#allocation7] sm:$0xff] %v173_v63  ;;  %v252_v5 = vadd.f32 %v251_v4, %v94_v61 }
 0x112   :  { %262 = vst [vmem:[#allocation7 + $0x10] sm:$0xff] %v250_v2  ;;  %261 = vst [vmem:[#allocation7 + $0x8] sm:$0xff] %v175_v3  ;;  %v178_v6 = vpop.f32.mrb[2].mxu0 }
 0x113   :  { %263 = vst [vmem:[#allocation7 + $0x18] sm:$0xff] %v252_v5  ;;  %v179_v7 = vadd.f32 %v178_v6, %v82_v58  ;;  %v255_v8 = vpop.f32.mrb[2].mxu1  ;;  %v180_v9 = vpop.f32.mrb[3].mxu0 }
 0x114   :  { %v256_v10 = vadd.f32 %v255_v8, %v90_v59  ;;  %v181_v11 = vadd.f32 %v180_v9, %v86_v60  ;;  %v257_v12 = vpop.f32.mrb[3].mxu1 }
 0x115   :  { %264 = vst [vmem:[#allocation7 + $0x20] sm:$0xff] %v179_v7  ;;  %v258_v13 = vadd.f32 %v257_v12, %v94_v61 }
 0x116   :  { %266 = vst [vmem:[#allocation7 + $0x30] sm:$0xff] %v256_v10  ;;  %265 = vst [vmem:[#allocation7 + $0x28] sm:$0xff] %v181_v11 }
 0x117   :  { %267 = vst [vmem:[#allocation7 + $0x38] sm:$0xff] %v258_v13 }
 0x118   :  { %385 = shalt.err (!%p382_p6)
}
 0x119   :  { %s386_s17 = scalar_lea.hbm %s482_s3, 1024 }
 0x11a   :  { %p387_p7 = scmp.ne.s32.totalorder %s482_s3, %s386_s17  ;;  %p390_p8 = scmp.lt.u32.totalorder %s386_s17, %s482_s3 }
 0x11c   :  { %p392_p9 = pnand %p390_p8, %p387_p7 }
 0x11e   :  { %395 = shalt.err (!%p392_p9)
}
 0x11f   :  { %279 = dma.vmem_to_hbm [thread:$0]  %s274_s13, 1024, %s482_s3, [#allocation4], %s406_s0, %s406_s0, %s407_s9  }
 0x120   :  { %400 = dma.done.wait [#allocation4], 1024  }
 0x121   :  { %401 = vsyncadd [#allocation4], 4294966272 }
 0x122   :  { %283 = vsyncpa [#allocation3], 1 }
 0x123   :  { %284 = vsyncpa [#allocation6], 1 }
 0x124   :  { %285 = vsyncpa [#allocation4], 1 }

</bundles_post_ra>
